<compile_context>
chip_gen: v7x
topology: tpu7x:2x2x1
jax: 0.10.0
libtpu: 0.0.40
codegen_flags: <defaults>
</compile_context>

<pallas_src>
import functools

import jax
import jax.numpy as jnp
from jax import lax
from jax.experimental import pallas as pl
from jax.experimental.pallas import tpu as pltpu


_SMALL_C_THRESHOLD = 128            # below this, use the class-major layout
_TILE_F32_BYTES = 4 * 1024 * 1024   # target size of one f32-widened logits tile
_VMEM_LIMIT_BYTES = 48 * 1024 * 1024


def _round_up(x, m):
    return ((x + m - 1) // m) * m


def _choose_tile(batch, num_classes, align):
    """Batch rows/columns per tile.

    Byte-capped (no row cap): ~4 MiB of f32-widened logits per tile amortizes
    the ~0.35us/step grid overhead, while 2x native-dtype input buffers +
    ~3 full-tile f32 temporaries + tiny outputs stay well under the 48 MiB
    vmem_limit_bytes on every generation (v5e/v6e 128 MiB, v7x 64 MiB phys).
    Also clamps so the grid has >= 2 steps when the batch allows (v7x 2 TCs).
    """
    per_elem_f32 = num_classes * 4
    tb = max(align, (_TILE_F32_BYTES // max(per_elem_f32, 1)) // align * align)
    tb = min(tb, _round_up(batch, align))
    if batch > align:  # splittable: guarantee at least 2 grid steps
        tb = min(tb, _round_up(_round_up(batch, align) // 2, align))
    return int(tb)


def _ordinal_loss_kernel_cmajor(logits_ref, targets_ref, out_ref):
    """Class-major layout: logits (C, TB); targets/out (1, TB) lane-dense."""
    x = logits_ref[...].astype(jnp.float32)      # widen on VPU; HBM stays native
    t = targets_ref[...]                         # (1, TB) int32
    c, tb = x.shape

    cls = lax.broadcasted_iota(jnp.int32, (c, tb), 0)   # class id per sublane row

    # Target gather + argmax first so x is not live across the exp pass.
    m = jnp.max(x, axis=0, keepdims=True)                               # (1, TB)
    target_logit = jnp.sum(jnp.where(cls == t, x, 0.0), axis=0, keepdims=True)
    pred = jnp.min(jnp.where(x == m, cls, jnp.int32(c)), axis=0, keepdims=True)

    lse = m + jnp.log(jnp.sum(jnp.exp(x - m), axis=0, keepdims=True))
    base_loss = lse - target_logit                                      # (1, TB)
    dist = jnp.abs(pred - t).astype(jnp.float32)
    out_ref[...] = (1.0 + dist) * base_loss


def _ordinal_loss_kernel_rmajor(logits_ref, targets_ref, out_ref):
    """Row-major layout: logits (TB, C); targets/out (TB, 1)."""
    x = logits_ref[...].astype(jnp.float32)
    t = targets_ref[...]                         # (TB, 1) int32
    tb, c = x.shape

    cls = lax.broadcasted_iota(jnp.int32, (tb, c), 1)

    m = jnp.max(x, axis=-1, keepdims=True)                              # (TB, 1)
    target_logit = jnp.sum(jnp.where(cls == t, x, 0.0), axis=-1, keepdims=True)
    pred = jnp.min(jnp.where(x == m, cls, jnp.int32(c)), axis=-1, keepdims=True)

    lse = m + jnp.log(jnp.sum(jnp.exp(x - m), axis=-1, keepdims=True))
    base_loss = lse - target_logit
    dist = jnp.abs(pred - t).astype(jnp.float32)
    out_ref[...] = (1.0 + dist) * base_loss


@functools.partial(jax.jit, static_argnames=("num_classes",))
def ordinal_loss(logits, targets, num_classes=None):
    """logits: (B, C) any float dtype; targets: (B,) int.  Returns (B,) f32,
    matching torch OrdinalLoss.forward.  `num_classes` is accepted only for
    API parity with the torch module and is not used."""
    del num_classes
    B, C = logits.shape
    itemsize = jnp.dtype(logits.dtype).itemsize
    targets_i32 = targets.astype(jnp.int32)

    cost = pl.CostEstimate(
        flops=6 * B * C,
        transcendentals=B * (C + 1),          # exp per class + log per row
        bytes_accessed=B * C * itemsize + 8 * B,
    )
    cparams = pltpu.CompilerParams(
        dimension_semantics=("parallel",),
        vmem_limit_bytes=_VMEM_LIMIT_BYTES,
    )

    if C < _SMALL_C_THRESHOLD:
        # ---- class-major path: batch on the lane axis ----
        tb = _choose_tile(B, C, 128)
        b_pad = _round_up(B, tb)
        logits_t = jnp.transpose(logits)                      # (C, B)
        if b_pad != B:
            # Padded columns give harmless finite values, sliced off below.
            logits_t = jnp.pad(logits_t, ((0, 0), (0, b_pad - B)))
            targets_i32 = jnp.pad(targets_i32, (0, b_pad - B))
        targets2d = targets_i32.reshape(1, b_pad)

        out = pl.pallas_call(
            _ordinal_loss_kernel_cmajor,
            out_shape=jax.ShapeDtypeStruct((1, b_pad), jnp.float32),
            grid_spec=pltpu.PrefetchScalarGridSpec(
                num_scalar_prefetch=0,
                grid=(b_pad // tb,),
                in_specs=[
                    pl.BlockSpec((C, tb), lambda i: (0, i)),
                    pl.BlockSpec((1, tb), lambda i: (0, i)),
                ],
                out_specs=pl.BlockSpec((1, tb), lambda i: (0, i)),
            ),
            compiler_params=cparams,
            cost_estimate=cost,
        )(logits_t, targets2d)
        return out[0, :B]

    # ---- row-major path: lanes already full for C >= 128 ----
    tb = _choose_tile(B, C, 8)
    b_pad = _round_up(B, tb)
    if b_pad != B:
        logits = jnp.pad(logits, ((0, b_pad - B), (0, 0)))
        targets_i32 = jnp.pad(targets_i32, (0, b_pad - B))
    targets2d = targets_i32.reshape(b_pad, 1)

    out = pl.pallas_call(
        _ordinal_loss_kernel_rmajor,
        out_shape=jax.ShapeDtypeStruct((b_pad, 1), jnp.float32),
        grid_spec=pltpu.PrefetchScalarGridSpec(
            num_scalar_prefetch=0,
            grid=(b_pad // tb,),
            in_specs=[
                pl.BlockSpec((tb, C), lambda i: (i, 0)),
                pl.BlockSpec((tb, 1), lambda i: (i, 0)),
            ],
            out_specs=pl.BlockSpec((tb, 1), lambda i: (i, 0)),
        ),
        compiler_params=cparams,
        cost_estimate=cost,
    )(logits, targets2d)
    return out[:B, 0]


def _reference(logits, targets):
    logits = logits.astype(jnp.float32)
    lse = jax.scipy.special.logsumexp(logits, axis=1)
    tgt_logit = jnp.take_along_axis(logits, targets[:, None], axis=1)[:, 0]
    base = lse - tgt_logit
    pred = jnp.argmax(logits, axis=1)
    dist = jnp.abs(pred - targets).astype(jnp.float32)
    return (1.0 + dist) * base


if __name__ == "__main__":
    key = jax.random.PRNGKey(0)
    k1, k2, k3, k4, k5, k6 = jax.random.split(key, 6)

    # 1) Small-C / class-major path (ViT classifier scale: C=10), f32.
    B1, C1 = 8, 10
    logits1 = jax.random.normal(k1, (B1, C1), dtype=jnp.float32)
    targets1 = jax.random.randint(k2, (B1,), 0, C1, dtype=jnp.int32)
    out1 = ordinal_loss(logits1, targets1, num_classes=C1)
    jax.block_until_ready(out1)
    ref1 = _reference(logits1, targets1)
    assert out1.shape == (B1,)
    assert jnp.allclose(out1, ref1, atol=1e-5, rtol=1e-5), (out1, ref1)

    # 2) Padding path (batch not a multiple of the lane tile), bf16 input.
    B2, C2 = 13, 10
    logits2 = jax.random.normal(k3, (B2, C2), dtype=jnp.bfloat16)
    targets2 = jax.random.randint(k4, (B2,), 0, C2, dtype=jnp.int32)
    out2 = ordinal_loss(logits2, targets2, num_classes=C2)
    jax.block_until_ready(out2)
    ref2 = _reference(logits2, targets2)
    assert out2.shape == (B2,)
    assert jnp.allclose(out2, ref2, atol=1e-4, rtol=1e-4), (out2, ref2)

    # 3) Large-C / row-major path.
    B3, C3 = 16, 256
    logits3 = jax.random.normal(k5, (B3, C3), dtype=jnp.float32)
    targets3 = jax.random.randint(k6, (B3,), 0, C3, dtype=jnp.int32)
    out3 = ordinal_loss(logits3, targets3, num_classes=C3)
    jax.block_until_ready(out3)
    ref3 = _reference(logits3, targets3)
    assert out3.shape == (B3,)
    assert jnp.allclose(out3, ref3, atol=1e-5, rtol=1e-5), (out3, ref3)

    print("KERNEL_OK")
</pallas_src>

<mosaic_0001>
module attributes {stable_mosaic.version = 11 : i64} {
  func.func @_ordinal_loss_kernel_cmajor(%arg0: i32, %arg1: memref<10x128xf32, #tpu.memory_space<vmem>>, %arg2: memref<1x128xi32, #tpu.memory_space<vmem>>, %arg3: memref<1x128xf32, #tpu.memory_space<vmem>>) attributes {dimension_semantics = [#tpu.dimension_semantics<parallel>], iteration_bounds = array<i64: 1>, scalar_prefetch = 0 : i64, scratch_operands = 0 : i64, tpu.core_type = #tpu.core_type<tc>, window_params = [{transform_indices = @transform_0, window_bounds = array<i64: 10, 128>}, {transform_indices = @transform_1, window_bounds = array<i64: 1, 128>}, {transform_indices = @transform_2, window_bounds = array<i64: 1, 128>}]} {
    %c0 = arith.constant 0 : index
    %c0_0 = arith.constant 0 : index
    %0 = vector.load %arg1[%c0, %c0_0] : memref<10x128xf32, #tpu.memory_space<vmem>>, vector<10x128xf32>
    %c0_1 = arith.constant 0 : index
    %c0_2 = arith.constant 0 : index
    %1 = vector.load %arg2[%c0_1, %c0_2] : memref<1x128xi32, #tpu.memory_space<vmem>>, vector<1x128xi32>
    %2 = tpu.iota {dimensions = array<i32: 0>} : vector<10x128xi32>
    %cst = arith.constant dense<0xFF800000> : vector<128xf32>
    %3 = vector.multi_reduction <maximumf>, %0, %cst [0] : vector<10x128xf32> to vector<128xf32>
    %4 = vector.shape_cast %3 : vector<128xf32> to vector<1x128xf32>
    %5 = vector.broadcast %1 : vector<1x128xi32> to vector<10x128xi32>
    %6 = arith.cmpi eq, %2, %5 : vector<10x128xi32>
    %cst_3 = arith.constant 0.000000e+00 : f32
    %7 = vector.broadcast %cst_3 : f32 to vector<10x128xf32>
    %8 = arith.select %6, %0, %7 : vector<10x128xi1>, vector<10x128xf32>
    %cst_4 = arith.constant dense<0.000000e+00> : vector<128xf32>
    %9 = vector.multi_reduction <add>, %8, %cst_4 [0] : vector<10x128xf32> to vector<128xf32>
    %10 = vector.shape_cast %9 : vector<128xf32> to vector<1x128xf32>
    %11 = vector.broadcast %4 : vector<1x128xf32> to vector<10x128xf32>
    %12 = arith.cmpf oeq, %0, %11 : vector<10x128xf32>
    %c10_i32 = arith.constant 10 : i32
    %13 = vector.broadcast %c10_i32 : i32 to vector<10x128xi32>
    %14 = arith.select %12, %2, %13 : vector<10x128xi1>, vector<10x128xi32>
    %cst_5 = arith.constant dense<2147483647> : vector<128xi32>
    %15 = vector.multi_reduction <minsi>, %14, %cst_5 [0] : vector<10x128xi32> to vector<128xi32>
    %16 = vector.shape_cast %15 : vector<128xi32> to vector<1x128xi32>
    %17 = vector.broadcast %4 : vector<1x128xf32> to vector<10x128xf32>
    %18 = arith.subf %0, %17 : vector<10x128xf32>
    %19 = math.exp %18 : vector<10x128xf32>
    %cst_6 = arith.constant dense<0.000000e+00> : vector<128xf32>
    %20 = vector.multi_reduction <add>, %19, %cst_6 [0] : vector<10x128xf32> to vector<128xf32>
    %21 = vector.shape_cast %20 : vector<128xf32> to vector<1x128xf32>
    %22 = math.log %21 : vector<1x128xf32>
    %23 = arith.addf %4, %22 : vector<1x128xf32>
    %24 = arith.subf %23, %10 : vector<1x128xf32>
    %25 = arith.subi %16, %1 : vector<1x128xi32>
    %26 = math.absi %25 : vector<1x128xi32>
    %27 = arith.sitofp %26 : vector<1x128xi32> to vector<1x128xf32>
    %cst_7 = arith.constant 1.000000e+00 : f32
    %28 = vector.broadcast %cst_7 : f32 to vector<1x128xf32>
    %29 = arith.addf %28, %27 : vector<1x128xf32>
    %30 = arith.mulf %29, %24 : vector<1x128xf32>
    %c0_8 = arith.constant 0 : index
    %c0_9 = arith.constant 0 : index
    %31 = vector.load %arg3[%c0_8, %c0_9] : memref<1x128xf32, #tpu.memory_space<vmem>>, vector<1x128xf32>
    tpu.vector_store %arg3[%c0_8, %c0_9], %30 {strides = array<i32>} : memref<1x128xf32, #tpu.memory_space<vmem>>, vector<1x128xf32>,
    return
  }
  func.func @transform_0(%arg0: i32) -> (i32, i32) {
    %c0_i32 = arith.constant 0 : i32
    %c0_i32_0 = arith.constant 0 : i32
    return %c0_i32, %arg0 : i32, i32
  }
  func.func @transform_1(%arg0: i32) -> (i32, i32) {
    %c0_i32 = arith.constant 0 : i32
    %c0_i32_0 = arith.constant 0 : i32
    return %c0_i32, %arg0 : i32, i32
  }
  func.func @transform_2(%arg0: i32) -> (i32, i32) {
    %c0_i32 = arith.constant 0 : i32
    %c0_i32_0 = arith.constant 0 : i32
    return %c0_i32, %arg0 : i32, i32
  }
}

</mosaic_0001>

<bundles_post_ra>
// kernel: ordinal_loss.1
= control target key start
LH: loop header
LB: loop body
LE: loop exit
PB: predicated region body
PF: predicated region fallthrough
CT: control target
= control target key end

     0   :  { %vm17_vm0 = vcmask 1041408   ;;  %v14_v5 = vlaneseq  ;;  %s126_s0 = inlined_call_operand.vmem [shape: f32[10,128], index: 0, kind: input, shape index: {}]   ;;  %s127_s1 = inlined_call_operand.vmem [shape: s32[1,128], index: 1, kind: input, shape index: {}]   ;;  %s128_s2 = inlined_call_operand.vmem [shape: f32[1,128], index: 2, kind: output, shape index: {}]  }
   0x1   :  { %v11_v0 = vld [vmem:[%s126_s0] sm:$0xff]  ;;  %v12_v1 = vld [vmem:[%s126_s0 + $0x8] sm:$0x3] }
   0x2   :  { %v18_v2 = vsel %vm17_vm0, %v12_v1, -inf  ;;  %v15_v8 = vshrl.u32 %v14_v5, 7  ;;  %v13_v18 = vld [vmem:[%s127_s1] sm:$0x1] }
   0x3   :  { %v19_v3 = vmax.f32 %v11_v0, %v18_v2 }
   0x4   :  { %v16_v11 = vadd.s32 8, %v15_v8  ;;  %v28_v14 = vsub.s32 0, %v15_v8 }
   0x5   :  { %v20_v4 = vrot.slane %v19_v3, 4 }
   0x6   :  { %v29_v23 = vrot.slane %v13_v18, %v28_v14 }
   0x7   :  { %v21_v6 = vmax.f32 %v19_v3, %v20_v4 }
   0x8   :  { %vm31_vm5 = vcmp.eq.s32.totalorder %v16_v11, %v29_v23  ;;  %vm30_vm6 = vcmp.eq.s32.totalorder %v15_v8, %v29_v23 }
   0x9   :  { %v22_v7 = vrot.slane %v21_v6, 2  ;;  %v33_v27 = vsel %vm31_vm5, %v12_v1, 0.0  ;;  %v32_v30 = vsel %vm30_vm6, %v11_v0, 0.0 }
   0xa   :  { %v34_v31 = vsel %vm17_vm0, %v33_v27, 0.0 }
   0xb   :  { %v23_v9 = vmax.f32 %v21_v6, %v22_v7  ;;  %v35_v35 = vadd.f32 %v34_v31, %v32_v30 }
   0xd   :  { %v24_v10 = vrot.slane %v23_v9, 1  ;;  %v36_v39 = vrot.slane %v35_v35, 4 }
   0xf   :  { %v25_v12 = vmax.f32 %v23_v9, %v24_v10  ;;  %v37_v43 = vadd.f32 %v36_v39, %v35_v35 }
  0x11   :  { %vm42_vm1 = vcmp.eq.f32.partialorder %v11_v0, %v25_v12  ;;  %vm43_vm2 = vcmp.eq.f32.partialorder %v12_v1, %v25_v12  ;;  %v58_v13 = vsub.f32 %v11_v0, %v25_v12  ;;  %v59_v17 = vsub.f32 %v12_v1, %v25_v12 }
  0x12   :  { %v44_v15 = vsel %vm42_vm1, %v15_v8, 10  ;;  %v45_v16 = vsel %vm43_vm2, %v16_v11, 10  ;;  %v38_v47 = vrot.slane %v37_v43, 2 }
  0x13   :  { %v46_v19 = vsel %vm17_vm0, %v45_v16, 2147483647  ;;  %v60_v20 = vmul.f32 1.442695, %v58_v13  ;;  %v62_v21 = vmul.f32 1.442695, %v59_v17 }
  0x14   :  { %vm47_vm3 = vcmp.lt.s32.totalorder %v44_v15, %v46_v19  ;;  %v39_v49 = vadd.f32 %v38_v47, %v37_v43 }
  0x15   :  { %v48_v22 = vsel %vm47_vm3, %v44_v15, %v46_v19  ;;  %89 = vpow2.f32 %v60_v20 }
  0x16   :  { %v49_v24 = vrot.slane %v48_v22, 4  ;;  %91 = vpow2.f32 %v62_v21  ;;  %v40_v51 = vrot.slane %v39_v49, 1 }
  0x18   :  { %vm50_vm4 = vcmp.lt.s32.totalorder %v48_v22, %v49_v24  ;;  %v41_v54 = vadd.f32 %v40_v51, %v39_v49 }
  0x19   :  { %v51_v25 = vsel %vm50_vm4, %v48_v22, %v49_v24 }
  0x1a   :  { %v52_v26 = vrot.slane %v51_v25, 2 }
  0x1c   :  { %vm53_vm7 = vcmp.lt.s32.totalorder %v51_v25, %v52_v26 }
  0x1d   :  { %v54_v32 = vsel %vm53_vm7, %v51_v25, %v52_v26 }
  0x1e   :  { %v55_v36 = vrot.slane %v54_v32, 1 }
  0x1f   :  { %v90_v28 = vpop.eup %89 }
  0x20   :  { %v92_v29 = vpop.eup %91  ;;  %vm56_vm8 = vcmp.lt.s32.totalorder %v54_v32, %v55_v36 }
  0x21   :  { %v64_v33 = vsel %vm17_vm0, %v92_v29, 0.0  ;;  %v57_v41 = vsel %vm56_vm8, %v54_v32, %v55_v36 }
  0x22   :  { %v65_v34 = vadd.f32 %v90_v28, %v64_v33  ;;  %v76_v45 = vsub.s32 %v57_v41, %v13_v18 }
  0x24   :  { %v66_v37 = vrot.slane %v65_v34, 4  ;;  %v78_v48 = vsub.s32 0, %v76_v45 }
  0x26   :  { %v67_v38 = vadd.f32 %v66_v37, %v65_v34  ;;  %v88_v50 = vmin.u32 %v78_v48, %v76_v45 }
  0x28   :  { %v68_v40 = vrot.slane %v67_v38, 2  ;;  %v80_v52 = vcvt.s32.f32 %v88_v50 }
  0x2a   :  { %v69_v42 = vadd.f32 %v68_v40, %v67_v38  ;;  %v81_v57 = vadd.f32 1.0, %v80_v52 }
  0x2c   :  { %v70_v44 = vrot.slane %v69_v42, 1 }
  0x2e   :  { %v71_v46 = vadd.f32 %v70_v44, %v69_v42 }
  0x30   :  { %93 = vlog2.f32 %v71_v46 }
  0x3a   :  { %v94_v53 = vpop.eup %93 }
  0x3b   :  { %v73_v55 = vmul.f32 0.6931472, %v94_v53 }
  0x3d   :  { %v74_v56 = vadd.f32 %v73_v55, %v25_v12 }
  0x3f   :  { %v75_v58 = vsub.f32 %v74_v56, %v41_v54 }
  0x41   :  { %v82_v59 = vmul.f32 %v81_v57, %v75_v58 }
  0x43   :  { %83 = vst [vmem:[%s128_s2] sm:$0x1] %v82_v59 }

</bundles_post_ra>
